<compile_context>
chip_gen: v5e
topology: v5e:2x2
jax: 0.10.0
libtpu: 0.0.40
codegen_flags: <defaults>
</compile_context>

<pallas_src>
import functools
import math

import jax
import jax.numpy as jnp
from jax.experimental import pallas as pl
from jax.experimental.pallas import tpu as pltpu

_VMEM_LIMIT = 32 * 1024 * 1024          # explicit scoped-VMEM limit
_FUSED_BLOCK_BUDGET = 4 * 1024 * 1024   # per-sample (C, H*W) block for fused path
_TILE_BUDGET = 2 * 1024 * 1024          # per (C, tile_hw) block for two-pass path


# ---------------------------------------------------------------------------
# Fused path: one grid step per batch sample; reads x once.
# ---------------------------------------------------------------------------
def _se_fused_kernel(x_ref, w1_ref, b1_ref, w2_ref, b2_ref, o_ref):
    x = x_ref[...]                                         # (C, HW)
    xf = x.astype(jnp.float32)
    # squeeze: keepdims keeps C on the sublane axis -> no relayout later
    pooled = jnp.mean(xf, axis=-1, keepdims=True)          # (C, 1)
    # excitation in column form: no transposes of the PyTorch-layout weights
    h = jnp.dot(w1_ref[...], pooled,
                preferred_element_type=jnp.float32) + b1_ref[...]   # (hidden, 1)
    h = jnp.maximum(h, 0.0)
    s = jnp.dot(w2_ref[...], h,
                preferred_element_type=jnp.float32) + b2_ref[...]   # (C, 1)
    s = jax.nn.sigmoid(s)
    # scale: broadcast over lanes only (C stayed on sublanes)
    o_ref[...] = (xf * s).astype(o_ref.dtype)


def _se_fused(x_flat, w1, b1c, w2, b2c):
    B, C, HW = x_flat.shape
    hidden = w1.shape[0]
    return pl.pallas_call(
        _se_fused_kernel,
        out_shape=jax.ShapeDtypeStruct((B, C, HW), x_flat.dtype),
        grid_spec=pltpu.PrefetchScalarGridSpec(
            num_scalar_prefetch=0,
            grid=(B,),
            in_specs=[
                pl.BlockSpec((None, C, HW), lambda b: (b, 0, 0)),
                pl.BlockSpec((hidden, C), lambda b: (0, 0)),
                pl.BlockSpec((hidden, 1), lambda b: (0, 0)),
                pl.BlockSpec((C, hidden), lambda b: (0, 0)),
                pl.BlockSpec((C, 1), lambda b: (0, 0)),
            ],
            out_specs=pl.BlockSpec((None, C, HW), lambda b: (b, 0, 0)),
        ),
        compiler_params=pltpu.CompilerParams(
            dimension_semantics=("parallel",),
            vmem_limit_bytes=_VMEM_LIMIT,
        ),
    )(x_flat, w1, b1c, w2, b2c)


# ---------------------------------------------------------------------------
# Two-pass path: (A) pool + FC with spatial reduction axis, (B) scale.
# Used when a per-sample (C, H*W) block is too large for a single VMEM block.
# ---------------------------------------------------------------------------
def _se_pool_fc_kernel(x_ref, w1_ref, b1_ref, w2_ref, b2_ref, s_ref, acc_ref,
                       *, inv_hw):
    j = pl.program_id(1)

    @pl.when(j == 0)
    def _():
        acc_ref[...] = jnp.zeros_like(acc_ref)

    # partial spatial sum for this chunk (f32 accumulation)
    acc_ref[...] += jnp.sum(x_ref[...].astype(jnp.float32),
                            axis=-1, keepdims=True)        # (C, 1)

    @pl.when(j == pl.num_programs(1) - 1)
    def _():
        pooled = acc_ref[...] * inv_hw                     # divide by true H*W
        h = jnp.dot(w1_ref[...], pooled,
                    preferred_element_type=jnp.float32) + b1_ref[...]
        h = jnp.maximum(h, 0.0)
        s = jnp.dot(w2_ref[...], h,
                    preferred_element_type=jnp.float32) + b2_ref[...]
        s_ref[...] = jax.nn.sigmoid(s)


def _se_scale_kernel(x_ref, s_ref, o_ref):
    o_ref[...] = (x_ref[...].astype(jnp.float32) * s_ref[...]).astype(o_ref.dtype)


def _pick_hw_tile(C, HW, itemsize, budget=_TILE_BUDGET):
    """Largest multiple-of-128 divisor of HW under the VMEM budget (no padding)."""
    if C * HW * itemsize <= budget:
        return HW
    if HW % 128 == 0:
        best = 128
        t = 128
        while t <= HW:
            if HW % t == 0 and C * t * itemsize <= budget:
                best = t
            t += 128
        return best
    # TODO(synk): pad/mask ragged spatial tiles when H*W is not a multiple of 128.
    return HW


def _se_two_pass(x_flat, w1, b1c, w2, b2c, tile_hw=None):
    B, C, HW = x_flat.shape
    hidden = w1.shape[0]
    if tile_hw is None:
        tile_hw = _pick_hw_tile(C, HW, x_flat.dtype.itemsize)
    assert HW % tile_hw == 0
    n_hw = HW // tile_hw
    inv_hw = 1.0 / float(HW)

    # Pass A: global average pool (reduction over spatial chunks) + tiny FC.
    s = pl.pallas_call(
        functools.partial(_se_pool_fc_kernel, inv_hw=inv_hw),
        out_shape=jax.ShapeDtypeStruct((B, C, 1), jnp.float32),
        grid_spec=pltpu.PrefetchScalarGridSpec(
            num_scalar_prefetch=0,
            grid=(B, n_hw),
            in_specs=[
                pl.BlockSpec((None, C, tile_hw), lambda b, j: (b, 0, j)),
                pl.BlockSpec((hidden, C), lambda b, j: (0, 0)),
                pl.BlockSpec((hidden, 1), lambda b, j: (0, 0)),
                pl.BlockSpec((C, hidden), lambda b, j: (0, 0)),
                pl.BlockSpec((C, 1), lambda b, j: (0, 0)),
            ],
            out_specs=pl.BlockSpec((None, C, 1), lambda b, j: (b, 0, 0)),
            scratch_shapes=[pltpu.VMEM((C, 1), jnp.float32)],
        ),
        compiler_params=pltpu.CompilerParams(
            dimension_semantics=("parallel", "arbitrary"),
            vmem_limit_bytes=_VMEM_LIMIT,
        ),
    )(x_flat, w1, b1c, w2, b2c)

    # Pass B: broadcast scale, fully parallel over (batch, spatial chunk).
    out_flat = pl.pallas_call(
        _se_scale_kernel,
        out_shape=jax.ShapeDtypeStruct((B, C, HW), x_flat.dtype),
        grid_spec=pltpu.PrefetchScalarGridSpec(
            num_scalar_prefetch=0,
            grid=(B, n_hw),
            in_specs=[
                pl.BlockSpec((None, C, tile_hw), lambda b, j: (b, 0, j)),
                pl.BlockSpec((None, C, 1), lambda b, j: (b, 0, 0)),
            ],
            out_specs=pl.BlockSpec((None, C, tile_hw), lambda b, j: (b, 0, j)),
        ),
        compiler_params=pltpu.CompilerParams(
            dimension_semantics=("parallel", "parallel"),
            vmem_limit_bytes=_VMEM_LIMIT,
        ),
    )(x_flat, s)
    return out_flat


# ---------------------------------------------------------------------------
# Public wrapper
# ---------------------------------------------------------------------------
def se_layer(x_nchw, w1, b1, w2, b2, *, force_two_pass=False, tile_hw=None):
    """x_nchw: (B, C, H, W). w1/b1/w2/b2 follow PyTorch Linear conventions."""
    B, C, H, W = x_nchw.shape
    hidden = w1.shape[0]
    HW = H * W
    x_flat = x_nchw.reshape(B, C, HW)

    # column-form biases (2-D, channels on sublanes) -> clean (sublane, lane) layout
    b1c = b1.reshape(hidden, 1).astype(jnp.float32)
    b2c = b2.reshape(C, 1).astype(jnp.float32)
    w1f = w1.astype(jnp.float32)
    w2f = w2.astype(jnp.float32)

    fused_ok = (C * HW * x_flat.dtype.itemsize) <= _FUSED_BLOCK_BUDGET
    if fused_ok and not force_two_pass:
        out_flat = _se_fused(x_flat, w1f, b1c, w2f, b2c)
    else:
        out_flat = _se_two_pass(x_flat, w1f, b1c, w2f, b2c, tile_hw=tile_hw)
    return out_flat.reshape(B, C, H, W)


def init_se_params(key, channel, reduction=16):
    """Deterministic init mimicking PyTorch Linear defaults."""
    hidden = math.floor(channel / reduction)
    k1, k2, k3, k4 = jax.random.split(key, 4)
    bound1 = 1.0 / math.sqrt(channel)
    bound2 = 1.0 / math.sqrt(hidden)
    w1 = jax.random.uniform(k1, (hidden, channel), jnp.float32, -bound1, bound1)
    b1 = jax.random.uniform(k2, (hidden,), jnp.float32, -bound1, bound1)
    w2 = jax.random.uniform(k3, (channel, hidden), jnp.float32, -bound2, bound2)
    b2 = jax.random.uniform(k4, (channel,), jnp.float32, -bound2, bound2)
    return w1, b1, w2, b2


def se_layer_ref(x, w1, b1, w2, b2):
    """Pure-JAX reference."""
    y = jnp.mean(x, axis=(2, 3))
    y = jnp.maximum(y @ w1.T + b1, 0.0)
    y = jax.nn.sigmoid(y @ w2.T + b2)
    return x * y[:, :, None, None]


if __name__ == "__main__":
    key = jax.random.PRNGKey(0)
    kx, kp = jax.random.split(key)

    # channel=64, reduction=16 -> hidden=4; H*W=256 keeps the lane axis dense.
    B, C, H, W = 2, 64, 16, 16
    x = jax.random.normal(kx, (B, C, H, W), dtype=jnp.float32)
    w1, b1, w2, b2 = init_se_params(kp, C, reduction=16)
    ref = se_layer_ref(x, w1, b1, w2, b2)

    # 1) fused path (single HBM pass, grid over batch)
    out_fused = jax.block_until_ready(se_layer(x, w1, b1, w2, b2))
    assert out_fused.shape == (B, C, H, W)
    assert jnp.allclose(out_fused, ref, atol=1e-5, rtol=1e-5), "fused path mismatch"

    # 2) two-pass path (pool+FC reduction, then parallel scale), forced + tiled
    out_2p = jax.block_until_ready(
        se_layer(x, w1, b1, w2, b2, force_two_pass=True, tile_hw=128))
    assert jnp.allclose(out_2p, ref, atol=1e-5, rtol=1e-5), "two-pass path mismatch"

    # 3) bf16 storage variant (halves HBM traffic on v6e/v7x); loose tolerance
    out_bf16 = jax.block_until_ready(
        se_layer(x.astype(jnp.bfloat16), w1, b1, w2, b2))
    assert jnp.allclose(out_bf16.astype(jnp.float32), ref, atol=5e-2, rtol=5e-2), \
        "bf16 path mismatch"

    print("KERNEL_OK")
</pallas_src>

<mosaic_0001>
module attributes {stable_mosaic.version = 11 : i64} {
  func.func @_se_fused_kernel(%arg0: i32, %arg1: memref<1x64x256xf32, #tpu.memory_space<vmem>>, %arg2: memref<4x64xf32, #tpu.memory_space<vmem>>, %arg3: memref<4x1xf32, #tpu.memory_space<vmem>>, %arg4: memref<64x4xf32, #tpu.memory_space<vmem>>, %arg5: memref<64x1xf32, #tpu.memory_space<vmem>>, %arg6: memref<1x64x256xf32, #tpu.memory_space<vmem>>) attributes {dimension_semantics = [#tpu.dimension_semantics<parallel>], iteration_bounds = array<i64: 2>, scalar_prefetch = 0 : i64, scratch_operands = 0 : i64, tpu.core_type = #tpu.core_type<tc>, window_params = [{transform_indices = @transform_0, window_bounds = array<i64: 1, 64, 256>}, {pipeline_mode = #tpu.pipeline_mode<synchronous>, transform_indices = @transform_1, window_bounds = array<i64: 4, 64>}, {pipeline_mode = #tpu.pipeline_mode<synchronous>, transform_indices = @transform_2, window_bounds = array<i64: 4, 1>}, {pipeline_mode = #tpu.pipeline_mode<synchronous>, transform_indices = @transform_3, window_bounds = array<i64: 64, 4>}, {pipeline_mode = #tpu.pipeline_mode<synchronous>, transform_indices = @transform_4, window_bounds = array<i64: 64, 1>}, {transform_indices = @transform_5, window_bounds = array<i64: 1, 64, 256>}]} {
    %c0 = arith.constant 0 : index
    %c0_0 = arith.constant 0 : index
    %c0_1 = arith.constant 0 : index
    %0 = vector.load %arg1[%c0, %c0_0, %c0_1] : memref<1x64x256xf32, #tpu.memory_space<vmem>>, vector<1x64x256xf32>
    %1 = vector.shape_cast %0 : vector<1x64x256xf32> to vector<64x256xf32>
    %cst = arith.constant dense<0.000000e+00> : vector<64xf32>
    %2 = vector.multi_reduction <add>, %1, %cst [1] : vector<64x256xf32> to vector<64xf32>
    %3 = vector.shape_cast %2 : vector<64xf32> to vector<64x1xf32>
    %cst_2 = arith.constant 2.560000e+02 : f32
    %4 = vector.broadcast %cst_2 : f32 to vector<64x1xf32>
    %5 = arith.divf %3, %4 : vector<64x1xf32>
    %c0_3 = arith.constant 0 : index
    %c0_4 = arith.constant 0 : index
    %6 = vector.load %arg2[%c0_3, %c0_4] : memref<4x64xf32, #tpu.memory_space<vmem>>, vector<4x64xf32>
    %cst_5 = arith.constant dense<0.000000e+00> : vector<4x1xf32>
    %7 = tpu.matmul %6, %5, %cst_5 {dimension_numbers = #tpu.dot_dimension_numbers<[1], [0], [0], [1], [0, 0, 1, 1], [], []>} : vector<4x64xf32>, vector<64x1xf32>, vector<4x1xf32> -> vector<4x1xf32>
    %c0_6 = arith.constant 0 : index
    %c0_7 = arith.constant 0 : index
    %8 = vector.load %arg3[%c0_6, %c0_7] : memref<4x1xf32, #tpu.memory_space<vmem>>, vector<4x1xf32>
    %9 = arith.addf %7, %8 : vector<4x1xf32>
    %cst_8 = arith.constant 0.000000e+00 : f32
    %10 = vector.broadcast %cst_8 : f32 to vector<4x1xf32>
    %11 = arith.maximumf %9, %10 : vector<4x1xf32>
    %c0_9 = arith.constant 0 : index
    %c0_10 = arith.constant 0 : index
    %12 = vector.load %arg4[%c0_9, %c0_10] : memref<64x4xf32, #tpu.memory_space<vmem>>, vector<64x4xf32>
    %cst_11 = arith.constant dense<0.000000e+00> : vector<64x1xf32>
    %13 = tpu.matmul %12, %11, %cst_11 {dimension_numbers = #tpu.dot_dimension_numbers<[1], [0], [0], [1], [0, 0, 1, 1], [], []>} : vector<64x4xf32>, vector<4x1xf32>, vector<64x1xf32> -> vector<64x1xf32>
    %c0_12 = arith.constant 0 : index
    %c0_13 = arith.constant 0 : index
    %14 = vector.load %arg5[%c0_12, %c0_13] : memref<64x1xf32, #tpu.memory_space<vmem>>, vector<64x1xf32>
    %15 = arith.addf %13, %14 : vector<64x1xf32>
    %16 = arith.negf %15 : vector<64x1xf32>
    %17 = math.exp %16 : vector<64x1xf32>
    %cst_14 = arith.constant 1.000000e+00 : f32
    %18 = vector.broadcast %cst_14 : f32 to vector<64x1xf32>
    %19 = arith.addf %18, %17 : vector<64x1xf32>
    %20 = arith.divf %18, %19 : vector<64x1xf32>
    %21 = vector.broadcast %20 : vector<64x1xf32> to vector<64x256xf32>
    %22 = arith.mulf %1, %21 : vector<64x256xf32>
    %c0_15 = arith.constant 0 : index
    %c0_16 = arith.constant 0 : index
    %c0_17 = arith.constant 0 : index
    %23 = vector.load %arg6[%c0_15, %c0_16, %c0_17] : memref<1x64x256xf32, #tpu.memory_space<vmem>>, vector<1x64x256xf32>
    %24 = vector.shape_cast %23 : vector<1x64x256xf32> to vector<64x256xf32>
    %25 = vector.shape_cast %22 : vector<64x256xf32> to vector<1x64x256xf32>
    tpu.vector_store %arg6[%c0_15, %c0_16, %c0_17], %25 {strides = array<i32>} : memref<1x64x256xf32, #tpu.memory_space<vmem>>, vector<1x64x256xf32>,
    return
  }
  func.func @transform_0(%arg0: i32) -> (i32, i32, i32) {
    %c0_i32 = arith.constant 0 : i32
    %c0_i32_0 = arith.constant 0 : i32
    %c0_i32_1 = arith.constant 0 : i32
    return %arg0, %c0_i32, %c0_i32_0 : i32, i32, i32
  }
  func.func @transform_1(%arg0: i32) -> (i32, i32) {
    %c0_i32 = arith.constant 0 : i32
    %c0_i32_0 = arith.constant 0 : i32
    %c0_i32_1 = arith.constant 0 : i32
    return %c0_i32, %c0_i32_0 : i32, i32
  }
  func.func @transform_2(%arg0: i32) -> (i32, i32) {
    %c0_i32 = arith.constant 0 : i32
    %c0_i32_0 = arith.constant 0 : i32
    %c0_i32_1 = arith.constant 0 : i32
    return %c0_i32, %c0_i32_0 : i32, i32
  }
  func.func @transform_3(%arg0: i32) -> (i32, i32) {
    %c0_i32 = arith.constant 0 : i32
    %c0_i32_0 = arith.constant 0 : i32
    %c0_i32_1 = arith.constant 0 : i32
    return %c0_i32, %c0_i32_0 : i32, i32
  }
  func.func @transform_4(%arg0: i32) -> (i32, i32) {
    %c0_i32 = arith.constant 0 : i32
    %c0_i32_0 = arith.constant 0 : i32
    %c0_i32_1 = arith.constant 0 : i32
    return %c0_i32, %c0_i32_0 : i32, i32
  }
  func.func @transform_5(%arg0: i32) -> (i32, i32, i32) {
    %c0_i32 = arith.constant 0 : i32
    %c0_i32_0 = arith.constant 0 : i32
    %c0_i32_1 = arith.constant 0 : i32
    return %arg0, %c0_i32, %c0_i32_0 : i32, i32, i32
  }
}

</mosaic_0001>

<bundles_post_ra>
// kernel: tpu_custom_call.1
= control target key start
LH: loop header
LB: loop body
LE: loop exit
PB: predicated region body
PF: predicated region fallthrough
CT: control target
= control target key end

     0   :  { %10 = vsyncpa [#allocation3], 0  ;;  %s1325_s0 = inlined_call_operand.hbm [shape: f32[2,64,256], index: 0, kind: input, shape index: {}]   ;;  %s1326_s1 = inlined_call_operand.vmem [shape: f32[4,64], index: 1, kind: input, shape index: {}]   ;;  %s1327_s2 = inlined_call_operand.vmem [shape: f32[4,1], index: 2, kind: input, shape index: {}]   ;;  %s1328_s3 = inlined_call_operand.vmem [shape: f32[64,4], index: 3, kind: input, shape index: {}]   ;;  %s1329_s4 = inlined_call_operand.vmem [shape: f32[64,1], index: 4, kind: input, shape index: {}]   ;;  %s1330_s5 = inlined_call_operand.hbm [shape: f32[2,64,256], index: 5, kind: output, shape index: {}]  }
   0x1   :  { %12 = vsyncpa [#allocation3 + $0x1], 0 }
   0x2   :  { %13 = vsyncpa [#allocation4], 0 }
   0x3   :  { %15 = vsyncpa [#allocation4 + $0x1], 0  ;;  %s985_s18 = smov 0   ;;  %s987_s19 = smov 0  }
   0x4   :  { %s989_s20 = smov 0   ;;  %s991_s21 = smov 0  }
   0x5 LB: > { %s1006_s22 = sadd.s32 4294967295, %s947_s21   ;;  %s726_s23 = sadd.s32 4294967294, %s947_s21   ;;  %s947_s21 = sphi %s991_s21, %s1342_s21   ;;  %s943_s20 = sphi %s989_s20, %s1341_s20   ;;  %s939_s19 = sphi %s987_s19, %s1340_s19   ;;  %s935_s18 = sphi %s985_s18, %s1339_s18  }
   0x6   : > { %s1010_s24 = sadd.s32 1, %s947_s21   ;;  %s28_s25 = sadd.s32 1, %s943_s20 }
   0x7   : > { %s25_s26 = ssub.s32 %s947_s21, %s1010_s24  ;;  %p35_p0 = scmp.ne.s32.totalorder %s943_s20, %s939_s19 }
   0x8   : > { %p26_p1 = scmp.eq.s32.totalorder %s25_s26, 0  ;;  %p36_p2 = scmp.eq.s32.totalorder %s947_s21, 0 }
   0x9   : > { %p41_p3 = scmp.ne.s32.totalorder %s939_s19, %s935_s18  ;;  %p42_p4 = scmp.eq.s32.totalorder %s1006_s22, 0 }
   0xa   : > { %s1022_s27 = scalar_select %p26_p1, %s943_s20, %s28_s25  }
   0xb   : > { %p1024_p5 = por %p36_p2, %p35_p0  ;;  %p1028_p6 = por %p42_p4, %p41_p3 }
   0xc   : > { %p149_p7 = scmp.eq.s32.totalorder %s1006_s22, 1  ;;  %p155_p8 = scmp.eq.s32.totalorder %s726_s23, 1 }
   0xd   : > { %p774_p10 = scmp.lt.s32.totalorder %s947_s21, 2  ;;  %s187_s7 = sand.u32 1, %s943_s20  }
   0xe   : > { %p1035_p11 = por %p149_p7, %p35_p0  ;;  %p1039_p12 = por %p155_p8, %p41_p3 }
   0xf   : > { %s758_s8 = sshll.u32 %s947_s21, 7  ;;  %s729_s9 = sshll.u32 %s187_s7, 7 }
  0x10   : > { %s196_s12 = scalar_lea.hbm %s1325_s0, %s758_s8  ;;  %s191_s14 = scalar_lea.vmem [#allocation2], %s729_s9 }
  0x11   : > { %s197_s13 = sshll.u32 %s196_s12, 4  ;;  %s199_s15 = sshll.u32 %s191_s14, 4  ;;  %s198_s13 = int_to_ptr.hbm [resolvable:$true] %s197_s13  ;;  %s200_s15 = int_to_ptr.vmem [resolvable:$true] %s199_s15 }
  0x12   : > { %p1050_p13 = pnand %p774_p10, %p1024_p5  ;;  %p732_p0 = scmp.ge.s32.totalorder %s947_s21, 1 }
  0x13   : > { %p207_p1 = scmp.lt.s32.totalorder %s947_s21, 3  ;;  %s188_s17 = scalar_lea.sflag [#allocation3], %s187_s7 }
  0x14   : > { %s851_s23 = sshra.s32 %s198_s13, 4  ;;  %p855_p3 = pneg %p1050_p13  ;;  %s852_s23 = int_to_ptr.hbm [resolvable:$true] %s851_s23 }
  0x15   : > { %s853_s25 = scalar_lea.hbm %s852_s23, 128  ;;  %s858_s28 = scalar_lea.hbm %s1325_s0, 256 }
  0x16   : > { %p854_p2 = scmp.ne.s32.totalorder %s852_s23, %s853_s25  ;;  %p859_p5 = scmp.lt.s32.totalorder %s852_s23, %s1325_s0 }
  0x17   : > { %p860_p8 = scmp.lt.s32.totalorder %s858_s28, %s853_s25 }
  0x18   : > { %p856_p4 = pnand %p855_p3, %p854_p2 }
  0x19   : > { %p861_p10 = por %p860_p8, %p859_p5 }
  0x1a   : > { %p857_p7 = pneg %p856_p4 }
  0x1c   : > { %p862_p9 = pnand %p861_p10, %p857_p7 }
  0x1e   : > { %865 = shalt.err (!%p862_p9)
}
  0x1f   : > { %s949_s7 = smov 256   ;;  %s950_s11 = smov 16  }
  0x20   : > { %769 = dma.hbm_to_vmem [thread:$0]  (!%p1050_p13), %s198_s13, 2048, %s200_s15, %s188_s17, %s949_s7, %s949_s7, %s950_s11  }
  0x21   : > { %p208_p2 = pnand %p732_p0, %p207_p1 }
  0x22   : > { %s1071_s12 = sand.u32 (!%p208_p2), 1, %s939_s19  }
  0x23   : > { %211 = sbr.rel (%p208_p2) target bundleno = 626 (0x272), region = 40  ;;  %s733_s14 = sshll.u32 (!%p208_p2), %s1071_s12, 7 }
  0x24   : > { %s214_s23 = scalar_lea.sflag (!%p208_p2), [#allocation3], %s1071_s12  ;;  %s217_s25 = scalar_lea.vmem (!%p208_p2), [#allocation2], %s733_s14 }
  0x28   : > { %926 = dma.done.wait (%p1028_p6), %s214_s23, 2048  }
  0x29   : > { %928 = vsyncadd (%p1028_p6), %s214_s23, 4294965248  ;;  %v1081_v0 = vld [vmem:[%s217_s25 + $0x70] sm:$0xff]  ;;  %v1083_v1 = vld [vmem:[%s217_s25 + $0x78] sm:$0xff]  ;;  %v951_v24 = vmov 256.0   ;;  %vm302_vm1 = vcmask 523264   ;;  %vm368_vm2 = vcmask 1043456  }
  0x2a   : > { %v1085_v2 = vld [vmem:[%s217_s25 + $0x50] sm:$0xff]  ;;  %v282_v3 = vadd.f32 %v1083_v1, %v1081_v0  ;;  %v1089_v4 = vld [vmem:[%s217_s25 + $0x58] sm:$0xff]  ;;  %v1099_v9 = vld [vmem:[%s217_s25 + $0x60] sm:$0xff]  ;;  %817 = vrcp.f32 %v951_v24  ;;  %vm343_vm3 = vcmask 31744   ;;  %v952_v62 = vmov 0   ;;  %s1259_s9 = scalar_lea.vmem [#allocation5], %s733_s14 }
  0x2b   : > { %v276_v5 = vadd.f32 %v1089_v4, %v1085_v2  ;;  %v1093_v6 = vld [vmem:[%s217_s25 + $0x30] sm:$0xff]  ;;  %v1095_v7 = vld [vmem:[%s217_s25 + $0x38] sm:$0xff]  ;;  %v1101_v10 = vld [vmem:[%s217_s25 + $0x68] sm:$0xff]  ;;  %814 = vset.pattern.permute.xlu2 %v952_v62  ;;  %815 = vset.pattern.permute.xlu0 %v952_v62  ;;  %s759_s14 = sshll.u32 %s1006_s22, 7  ;;  %s650_s23 = sshll.u32 %s1259_s9, 4  ;;  %s651_s23 = int_to_ptr.vmem [resolvable:$true] %s650_s23 }
  0x2c   : > { %283 = vadd.xlane.f32.xlu0 %v282_v3  ;;  %v270_v8 = vadd.f32 %v1095_v7, %v1093_v6  ;;  %v1103_v11 = vld [vmem:[%s217_s25 + $0x40] sm:$0xff]  ;;  %v1105_v12 = vld [vmem:[%s217_s25 + $0x48] sm:$0xff]  ;;  %v279_v15 = vadd.f32 %v1101_v10, %v1099_v9  ;;  %v1117_v18 = vld [vmem:[%s217_s25 + $0x10] sm:$0xff]  ;;  %816 = vset.pattern.permute.xlu1 %v952_v62  ;;  %s649_s11 = scalar_lea.hbm %s1330_s5, %s759_s14  ;;  %s638_s22 = scalar_lea.sflag [#allocation4], %s1071_s12 }
  0x2d   : > { %277 = vadd.xlane.f32.xlu1 %v276_v5  ;;  %v1107_v13 = vld [vmem:[%s217_s25 + $0x20] sm:$0xff]  ;;  %v1109_v14 = vld [vmem:[%s217_s25 + $0x28] sm:$0xff]  ;;  %v273_v16 = vadd.f32 %v1105_v12, %v1103_v11  ;;  %v1119_v19 = vld [vmem:[%s217_s25 + $0x18] sm:$0xff]  ;;  %s901_s17 = scalar_lea.hbm %s1330_s5, 256 }
  0x2e   : > { %271 = vadd.xlane.f32.xlu2 %v270_v8  ;;  %v267_v17 = vadd.f32 %v1109_v14, %v1107_v13  ;;  %v1121_v20 = vld [vmem:[%s217_s25] sm:$0xff]  ;;  %v1123_v21 = vld [vmem:[%s217_s25 + $0x8] sm:$0xff]  ;;  %v264_v22 = vadd.f32 %v1119_v19, %v1117_v18  ;;  %v330_v53 = vld [vmem:[%s1328_s3 + $0x18] sm:$0xff]  ;;  %s652_s25 = sshll.u32 %s649_s11, 4  ;;  %s653_s25 = int_to_ptr.hbm [resolvable:$true] %s652_s25 }
  0x2f   : > { %v261_v23 = vadd.f32 %v1123_v21, %v1121_v20  ;;  %v300_v47 = vld [vmem:[%s1326_s1] sm:$0xf]  ;;  %v333_v54 = vld [vmem:[%s1328_s3 + $0x30] sm:$0xff]  ;;  %v328_v55 = vld [vmem:[%s1328_s3 + $0x8] sm:$0xff]  ;;  %s895_s29 = sshra.s32 %s653_s25, 4  ;;  %s896_s29 = int_to_ptr.hbm [resolvable:$true] %s895_s29 }
  0x30   : > { %v818_v25 = vpop.eup %817  ;;  %v301_v48 = vld [vmem:[%s1327_s2] sm:$0xf]  ;;  %v334_v57 = vld [vmem:[%s1328_s3 + $0x38] sm:$0xff]  ;;  %v329_v58 = vld [vmem:[%s1328_s3 + $0x10] sm:$0xff]  ;;  %s897_s13 = scalar_lea.hbm %s896_s29, 128  ;;  %p902_p0 = scmp.lt.s32.totalorder %s896_s29, %s1330_s5 }
  0x31   : > { %v286_v26 = vmul.f32 256.0, %v818_v25  ;;  %vm290_vm0 = vweird.f32 %v818_v25  ;;  %v327_v52 = vld [vmem:[%s1328_s3] sm:$0xff]  ;;  %v332_v59 = vld [vmem:[%s1328_s3 + $0x28] sm:$0xff]  ;;  %v338_v5 = vld [vmem:[%s1329_s4 + $0x18] sm:$0xff]  ;;  %p898_p6 = scmp.ne.s32.totalorder %s896_s29, %s897_s13  ;;  %p903_p1 = scmp.lt.s32.totalorder %s901_s17, %s897_s13 }
  0x32   : > { %v331_v56 = vld [vmem:[%s1328_s3 + $0x20] sm:$0xff]  ;;  %v341_v8 = vld [vmem:[%s1329_s4 + $0x30] sm:$0xff] }
  0x33   : > { %v287_v27 = vsub.f32 1.0, %v286_v26  ;;  %v335_v60 = vld [vmem:[%s1329_s4] sm:$0xff]  ;;  %p899_p9 = pnand %p898_p6, %p1035_p11  ;;  %p904_p3 = por %p903_p1, %p902_p0 }
  0x34   : > { %280 = vadd.xlane.f32.xlu0 %v279_v15  ;;  %v336_v15 = vld [vmem:[%s1329_s4 + $0x8] sm:$0xff] }
  0x35   : > { %274 = vadd.xlane.f32.xlu1 %v273_v16  ;;  %v288_v28 = vmul.f32 %v818_v25, %v287_v27  ;;  %p900_p13 = pneg %p899_p9 }
  0x36   : > { %268 = vadd.xlane.f32.xlu2 %v267_v17 }
  0x37   : > { %v289_v29 = vadd.f32 %v818_v25, %v288_v28  ;;  %p905_p4 = pnand %p904_p3, %p900_p13 }
  0x39   : > { %v291_v30 = vsel %vm290_vm0, %v818_v25, %v289_v29 }
  0x3c   : > { %265 = vadd.xlane.f32.xlu0 %v264_v22 }
  0x3d   : > { %262 = vadd.xlane.f32.xlu1 %v261_v23 }
  0x9f   : > { %v284_v31 = vpop.xlane.xlu0 %283 }
  0xa0   : > { %v299_v32 = vmul.f32 %v291_v30, %v284_v31  ;;  %v278_v33 = vpop.xlane.xlu1 %277  ;;  %v339_v31 = vld [vmem:[%s1329_s4 + $0x20] sm:$0xff] }
  0xa1   : > { %v272_v34 = vpop.xlane.xlu2 %271  ;;  %v297_v38 = vmul.f32 %v291_v30, %v278_v33  ;;  %v342_v33 = vld [vmem:[%s1329_s4 + $0x38] sm:$0xff] }
  0xa2   : > { %314 = vmatpush.msra.mxu0 %v299_v32  ;;  %v295_v41 = vmul.f32 %v291_v30, %v272_v34  ;;  %v337_v32 = vld [vmem:[%s1329_s4 + $0x10] sm:$0xff] }
  0xa7   : > { %v281_v35 = vpop.xlane.xlu0 %280 }
  0xa8   : > { %v298_v36 = vmul.f32 %v291_v30, %v281_v35  ;;  %v275_v37 = vpop.xlane.xlu1 %274 }
  0xa9   : > { %v296_v39 = vmul.f32 %v291_v30, %v275_v37  ;;  %v269_v40 = vpop.xlane.xlu2 %268 }
  0xaa   : > { %315 = vmatpush.msra.mxu0 %v298_v36  ;;  %v294_v42 = vmul.f32 %v291_v30, %v269_v40 }
  0xac   : > { %316 = vmatpush.msra.mxu0 %v297_v38 }
  0xae   : > { %317 = vmatpush.msra.mxu0 %v296_v39 }
  0xaf   : > { %v266_v43 = vpop.xlane.xlu0 %265 }
  0xb0   : > { %318 = vmatpush.msra.mxu0 %v295_v41  ;;  %v293_v44 = vmul.f32 %v291_v30, %v266_v43  ;;  %v263_v45 = vpop.xlane.xlu1 %262 }
  0xb1   : > { %v292_v46 = vmul.f32 %v291_v30, %v263_v45 }
  0xb2   : > { %319 = vmatpush.msra.mxu0 %v294_v42 }
  0xb4   : > { %320 = vmatpush.msra.mxu0 %v293_v44 }
  0xb6   : > { %321 = vmatpush.msra.mxu0 %v292_v46 }
  0xb7   : > { %735 = vmatmul.msk.f32.vlgmr.msra.gmra.mxu0 %vm302_vm1, %v300_v47 }
 0x134   : > { %v323_v49 = vpop.f32.mrf.mxu0 }
 0x135   : > { %v324_v50 = vadd.f32 %v323_v49, %v301_v48  ;;  %v340_v49 = vld [vmem:[%s1329_s4 + $0x28] sm:$0xff] }
 0x137   : > { %v326_v51 = vmax.f32 %v324_v50, 0.0 }
 0x139   : > { %736 = vmatpush.msk.msra.mxu1 %vm368_vm2, %v326_v51  ;;  %760 = vmatpush.msk.msra.mxu2 %vm368_vm2, %v326_v51 }
 0x13a   : > { %761 = vmatpush.msk.msra.mxu3 %vm368_vm2, %v326_v51  ;;  %737 = vmatmul.msk.f32.vlgmr.msra.gmra.mxu1 %vm343_vm3, %v327_v52 }
 0x13b   : > { %740 = vmatmul.msk.f32.vlgmr.msra.gmra.mxu2 %vm343_vm3, %v330_v53  ;;  %743 = vmatmul.msk.f32.vlgmr.msra.gmra.mxu3 %vm343_vm3, %v333_v54 }
 0x142   : > { %738 = vmatmul.msk.f32.gmra.mxu1 %vm343_vm3, %v328_v55 }
 0x143   : > { %741 = vmatmul.msk.f32.gmra.mxu2 %vm343_vm3, %v331_v56  ;;  %744 = vmatmul.msk.f32.gmra.mxu3 %vm343_vm3, %v334_v57 }
 0x14a   : > { %739 = vmatmul.msk.f32.gmra.mxu1 %vm343_vm3, %v329_v58 }
 0x14b   : > { %742 = vmatmul.msk.f32.gmra.mxu2 %vm343_vm3, %v332_v59 }
 0x1b7   : > { %v389_v61 = vpop.f32.mrf.mxu1 }
 0x1b8   : > { %v390_v63 = vadd.f32 %v389_v61, %v335_v60 }
 0x1ba   : > { %v745_v3 = vmul.f32 -1.442695, %v390_v63 }
 0x1bc   : > { %819 = vpow2.f32 %v745_v3 }
 0x1be   : > { %v398_v16 = vpop.f32.mrf.mxu2  ;;  %v407_v17 = vpop.f32.mrf.mxu3 }
 0x1bf   : > { %v399_v22 = vadd.f32 %v398_v16, %v338_v5  ;;  %v392_v23 = vpop.f32.mrf.mxu1  ;;  %v408_v24 = vadd.f32 %v407_v17, %v341_v8 }
 0x1c0   : > { %v393_v25 = vadd.f32 %v392_v23, %v336_v15 }
 0x1c1   : > { %v748_v26 = vmul.f32 -1.442695, %v399_v22  ;;  %v751_v29 = vmul.f32 -1.442695, %v408_v24 }
 0x1c2   : > { %v820_v27 = vpop.eup %819  ;;  %v746_v28 = vmul.f32 -1.442695, %v393_v25 }
 0x1c3   : > { %v437_v30 = vadd.f32 1.0, %v820_v27  ;;  %821 = vpow2.f32 %v748_v26 }
 0x1c4   : > { %823 = vpow2.f32 %v746_v28 }
 0x1c5   : > { %825 = vrcp.f32 %v437_v30  ;;  %v456_v55 = vand.u32 2147483648, %v437_v30  ;;  %v454_v57 = vand.u32 2147483647, %v437_v30  ;;  %vm450_vm5 = vweird.f32 %v437_v30 }
 0x1c6   : > { %827 = vpow2.f32 %v751_v29  ;;  %v401_v34 = vpop.f32.mrf.mxu2  ;;  %v410_v35 = vpop.f32.mrf.mxu3 }
 0x1c7   : > { %v402_v36 = vadd.f32 %v401_v34, %v339_v31  ;;  %v395_v37 = vpop.f32.mrf.mxu1  ;;  %v411_v39 = vadd.f32 %v410_v35, %v342_v33  ;;  %v457_v3 = vor.u32 1.1754944e-38, %v456_v55  ;;  %vm455_vm7 = vcmp.eq.f32.partialorder %v454_v57, 8.507059e+37 }
 0x1c8   : > { %v396_v38 = vadd.f32 %v395_v37, %v337_v32 }
 0x1c9   : > { %v822_v40 = vpop.eup %821  ;;  %v749_v41 = vmul.f32 -1.442695, %v402_v36  ;;  %v752_v48 = vmul.f32 -1.442695, %v411_v39 }
 0x1ca   : > { %v824_v42 = vpop.eup %823  ;;  %v1188_v43 = vadd.f32 1.0, %v822_v40  ;;  %v747_v44 = vmul.f32 -1.442695, %v396_v38 }
 0x1cb   : > { %v826_v45 = vpop.eup %825  ;;  %v1190_v46 = vadd.f32 1.0, %v824_v42  ;;  %829 = vpow2.f32 %v749_v41 }
 0x1cc   : > { %v828_v47 = vpop.eup %827  ;;  %831 = vrcp.f32 %v1188_v43  ;;  %v446_v50 = vmul.f32 %v826_v45, %v437_v30  ;;  %vm451_vm4 = vweird.f32 %v826_v45  ;;  %v501_v27 = vand.u32 2147483648, %v1188_v43 }
 0x1cd   : > { %833 = vrcp.f32 %v1190_v46  ;;  %v1197_v51 = vadd.f32 1.0, %v828_v47  ;;  %vm452_vm6 = vmor %vm450_vm5, %vm451_vm4  ;;  %v471_v26 = vand.u32 2147483648, %v1190_v46  ;;  %v469_v32 = vand.u32 2147483647, %v1190_v46 }
 0x1ce   : > { %835 = vpow2.f32 %v747_v44  ;;  %v404_v52 = vpop.f32.mrf.mxu2  ;;  %v447_v53 = vsub.f32 1.0, %v446_v50  ;;  %v499_v33 = vand.u32 2147483647, %v1188_v43  ;;  %vm465_vm10 = vweird.f32 %v1190_v46 }
 0x1cf   : > { %v405_v54 = vadd.f32 %v404_v52, %v340_v49  ;;  %837 = vpow2.f32 %v752_v48  ;;  %vm495_vm11 = vweird.f32 %v1188_v43  ;;  %v472_v39 = vor.u32 1.1754944e-38, %v471_v26 }
 0x1d0   : > { %v448_v56 = vmul.f32 %v826_v45, %v447_v53  ;;  %839 = vrcp.f32 %v1197_v51  ;;  %v502_v42 = vor.u32 1.1754944e-38, %v501_v27  ;;  %vm470_vm14 = vcmp.eq.f32.partialorder %v469_v32, 8.507059e+37 }
 0x1d1   : > { %v830_v58 = vpop.eup %829  ;;  %v750_v59 = vmul.f32 -1.442695, %v405_v54  ;;  %vm500_vm15 = vcmp.eq.f32.partialorder %v499_v33, 8.507059e+37  ;;  %vm540_vm2 = vweird.f32 %v1197_v51  ;;  %v544_v26 = vand.u32 2147483647, %v1197_v51 }
 0x1d2   : > { %v832_v60 = vpop.eup %831  ;;  %v1200_v61 = vadd.f32 1.0, %v830_v58  ;;  %v449_v62 = vadd.f32 %v826_v45, %v448_v56 }
 0x1d3   : > { %v834_v63 = vpop.eup %833  ;;  %841 = vpow2.f32 %v750_v59  ;;  %v491_v5 = vmul.f32 %v832_v60, %v1188_v43  ;;  %vm496_vm8 = vweird.f32 %v832_v60 }
 0x1d4   : > { %v836_v8 = vpop.eup %835  ;;  %843 = vrcp.f32 %v1200_v61  ;;  %v453_v15 = vsel %vm452_vm6, %v826_v45, %v449_v62  ;;  %v461_v16 = vmul.f32 %v834_v63, %v1190_v46  ;;  %vm466_vm9 = vweird.f32 %v834_v63  ;;  %vm497_vm12 = vmor %vm495_vm11, %vm496_vm8 }
 0x1d5   : > { %v1205_v17 = vadd.f32 1.0, %v836_v8  ;;  %v458_v22 = vsel %vm455_vm7, %v457_v3, %v453_v15  ;;  %v492_v23 = vsub.f32 1.0, %v491_v5  ;;  %v838_v24 = vpop.eup %837  ;;  %vm467_vm13 = vmor %vm465_vm10, %vm466_vm9  ;;  %v516_v53 = vand.u32 2147483648, %v1200_v61 }
 0x1d6   : > { %567 = vperm.xlu2 %814, %v458_v22   ;;  %v462_v25 = vsub.f32 1.0, %v461_v16  ;;  %v1209_v28 = vpop.eup %839  ;;  %v1212_v29 = vadd.f32 1.0, %v838_v24  ;;  %v514_v55 = vand.u32 2147483647, %v1200_v61  ;;  %vm510_vm1 = vweird.f32 %v1200_v61 }
 0x1d7   : > { %845 = vrcp.f32 %v1205_v17  ;;  %v493_v30 = vmul.f32 %v832_v60, %v492_v23  ;;  %v536_v40 = vmul.f32 %v1209_v28, %v1197_v51  ;;  %v486_v57 = vand.u32 2147483648, %v1205_v17 }
 0x1d8   : > { %v463_v31 = vmul.f32 %v834_v63, %v462_v25  ;;  %847 = vrcp.f32 %v1212_v29  ;;  %v484_v62 = vand.u32 2147483647, %v1205_v17  ;;  %vm480_vm5 = vweird.f32 %v1205_v17 }
 0x1d9   : > { %v842_v34 = vpop.eup %841  ;;  %v494_v35 = vadd.f32 %v832_v60, %v493_v30  ;;  %v537_v50 = vsub.f32 1.0, %v536_v40  ;;  %v517_v5 = vor.u32 1.1754944e-38, %v516_v53  ;;  %vm515_vm6 = vcmp.eq.f32.partialorder %v514_v55, 8.507059e+37 }
 0x1da   : > { %v844_v36 = vpop.eup %843  ;;  %v1218_v37 = vadd.f32 1.0, %v842_v34  ;;  %v464_v38 = vadd.f32 %v834_v63, %v463_v31  ;;  %vm541_vm7 = vweird.f32 %v1209_v28  ;;  %v487_v16 = vor.u32 1.1754944e-38, %v486_v57 }
 0x1db   : > { %v498_v41 = vsel %vm497_vm12, %v832_v60, %v494_v35  ;;  %v506_v44 = vmul.f32 %v844_v36, %v1200_v61  ;;  %vm511_vm0 = vweird.f32 %v844_v36  ;;  %v546_v24 = vand.u32 2147483648, %v1197_v51  ;;  %vm1242_vm10 = vmor %vm540_vm2, %vm541_vm7 }
 0x1dc   : > { %849 = vrcp.f32 %v1218_v37  ;;  %v468_v45 = vsel %vm467_vm13, %v834_v63, %v464_v38  ;;  %v503_v47 = vsel %vm500_vm15, %v502_v42, %v498_v41  ;;  %vm512_vm4 = vmor %vm510_vm1, %vm511_vm0  ;;  %v538_v63 = vmul.f32 %v1209_v28, %v537_v50 }
 0x1dd   : > { %v846_v43 = vpop.eup %845  ;;  %v473_v46 = vsel %vm470_vm14, %v472_v39, %v468_v45  ;;  %v507_v48 = vsub.f32 1.0, %v506_v44  ;;  %vm485_vm9 = vcmp.eq.f32.partialorder %v484_v62, 8.507059e+37  ;;  %v531_v34 = vand.u32 2147483648, %v1218_v37 }
 0x1de   : > { %572 = vperm.xlu0 %815, %v473_v46   ;;  %582 = vperm.xlu2 %814, %v503_v47   ;;  %v476_v49 = vmul.f32 %v846_v43, %v1205_v17  ;;  %v848_v56 = vpop.eup %847  ;;  %vm481_vm3 = vweird.f32 %v846_v43  ;;  %v539_v17 = vadd.f32 %v1209_v28, %v538_v63  ;;  %v547_v35 = vor.u32 1.1754944e-38, %v546_v24 }
 0x1df   : > { %v508_v52 = vmul.f32 %v844_v36, %v507_v48  ;;  %v551_v61 = vmul.f32 %v848_v56, %v1212_v29  ;;  %vm482_vm8 = vmor %vm480_vm5, %vm481_vm3  ;;  %vm525_vm12 = vweird.f32 %v1218_v37  ;;  %vm545_vm13 = vcmp.eq.f32.partialorder %v544_v26, 8.507059e+37 }
 0x1e0   : > { %v477_v54 = vsub.f32 1.0, %v476_v49  ;;  %v543_v38 = vsel %vm1242_vm10, %v1209_v28, %v539_v17  ;;  %v532_v40 = vor.u32 1.1754944e-38, %v531_v34  ;;  %vm555_vm0 = vweird.f32 %v1212_v29 }
 0x1e1   : > { %v509_v58 = vadd.f32 %v844_v36, %v508_v52  ;;  %v552_v32 = vsub.f32 1.0, %v551_v61  ;;  %v548_v41 = vsel %vm545_vm13, %v547_v35, %v543_v38  ;;  %vm556_vm1 = vweird.f32 %v848_v56 }
 0x1e2   : > { %v850_v59 = vpop.eup %849  ;;  %v478_v60 = vmul.f32 %v846_v43, %v477_v54  ;;  %v561_v44 = vand.u32 2147483648, %v1212_v29  ;;  %v559_v45 = vand.u32 2147483647, %v1212_v29  ;;  %vm557_vm2 = vmor %vm555_vm0, %vm556_vm1 }
 0x1e3   : > { %v513_v3 = vsel %vm512_vm4, %v844_v36, %v509_v58  ;;  %v521_v8 = vmul.f32 %v850_v59, %v1218_v37  ;;  %vm526_vm11 = vweird.f32 %v850_v59  ;;  %v529_v36 = vand.u32 2147483647, %v1218_v37 }
 0x1e4   : > { %v479_v15 = vadd.f32 %v846_v43, %v478_v60  ;;  %v518_v22 = vsel %vm515_vm6, %v517_v5, %v513_v3  ;;  %vm527_vm14 = vmor %vm525_vm12, %vm526_vm11  ;;  %v553_v39 = vmul.f32 %v848_v56, %v552_v32  ;;  %v562_v28 = vor.u32 1.1754944e-38, %v561_v44 }
 0x1e5   : > { %v522_v23 = vsub.f32 1.0, %v521_v8  ;;  %vm530_vm15 = vcmp.eq.f32.partialorder %v529_v36, 8.507059e+37  ;;  %vm560_vm3 = vcmp.eq.f32.partialorder %v559_v45, 8.507059e+37 }
 0x1e6   : > { %v483_v25 = vsel %vm482_vm8, %v846_v43, %v479_v15  ;;  %587 = vperm.xlu2 %814, %v518_v22   ;;  %v554_v37 = vadd.f32 %v848_v56, %v553_v39 }
 0x1e7   : > { %v488_v27 = vsel %vm485_vm9, %v487_v16, %v483_v25  ;;  %v523_v30 = vmul.f32 %v850_v59, %v522_v23 }
 0x1e8   : > { %577 = vperm.xlu1 %816, %v488_v27   ;;  %v558_v43 = vsel %vm557_vm2, %v848_v56, %v554_v37 }
 0x1e9   : > { %v524_v33 = vadd.f32 %v850_v59, %v523_v30  ;;  %v563_v46 = vsel %vm560_vm3, %v562_v28, %v558_v43 }
 0x1eb   : > { %v528_v51 = vsel %vm527_vm14, %v850_v59, %v524_v33 }
 0x1ec   : > { %v533_v42 = vsel %vm530_vm15, %v532_v40, %v528_v51 }
 0x1ee   : > { %597 = vperm.xlu2 %814, %v548_v41  }
 0x1f0   : > { %592 = vperm.xlu1 %816, %v533_v42  }
 0x1f8   : > { %602 = vperm.xlu1 %816, %v563_v46  }
 0x230   : > { %v568_v47 = vpop.permute.xlu2 %567 }
 0x231   : > { %v605_v48 = vmul.f32 %v568_v47, %v1121_v20  ;;  %v606_v49 = vmul.f32 %v568_v47, %v1123_v21 }
 0x233   : > { %621 = vst [vmem:[%s1259_s9] sm:$0xff] %v605_v48 }
 0x234   : > { %622 = vst [vmem:[%s1259_s9 + $0x8] sm:$0xff] %v606_v49 }
 0x238   : > { %v583_v29 = vpop.permute.xlu2 %582 }
 0x239   : > { %v611_v50 = vmul.f32 %v583_v29, %v1093_v6  ;;  %v612_v20 = vmul.f32 %v583_v29, %v1095_v7 }
 0x23b   : > { %627 = vst [vmem:[%s1259_s9 + $0x30] sm:$0xff] %v611_v50 }
 0x23c   : > { %628 = vst [vmem:[%s1259_s9 + $0x38] sm:$0xff] %v612_v20 }
 0x240   : > { %v588_v21 = vpop.permute.xlu2 %587 }
 0x241   : > { %v613_v52 = vmul.f32 %v588_v21, %v1103_v11  ;;  %v614_v53 = vmul.f32 %v588_v21, %v1105_v12 }
 0x243   : > { %629 = vst [vmem:[%s1259_s9 + $0x40] sm:$0xff] %v613_v52 }
 0x244   : > { %630 = vst [vmem:[%s1259_s9 + $0x48] sm:$0xff] %v614_v53 }
 0x248   : > { %v598_v54 = vpop.permute.xlu2 %597 }
 0x249   : > { %v617_v55 = vmul.f32 %v598_v54, %v1099_v9  ;;  %v618_v6 = vmul.f32 %v598_v54, %v1101_v10 }
 0x24b   : > { %633 = vst [vmem:[%s1259_s9 + $0x60] sm:$0xff] %v617_v55 }
 0x24c   : > { %634 = vst [vmem:[%s1259_s9 + $0x68] sm:$0xff] %v618_v6 }
 0x250   : > { %v573_v7 = vpop.permute.xlu0 %572 }
 0x251   : > { %v607_v56 = vmul.f32 %v573_v7, %v1117_v18  ;;  %v608_v11 = vmul.f32 %v573_v7, %v1119_v19 }
 0x253   : > { %623 = vst [vmem:[%s1259_s9 + $0x10] sm:$0xff] %v607_v56 }
 0x254   : > { %624 = vst [vmem:[%s1259_s9 + $0x18] sm:$0xff] %v608_v11 }
 0x25a   : > { %v578_v12 = vpop.permute.xlu1 %577 }
 0x25b   : > { %v609_v57 = vmul.f32 %v578_v12, %v1107_v13  ;;  %v610_v58 = vmul.f32 %v578_v12, %v1109_v14 }
 0x25d   : > { %625 = vst [vmem:[%s1259_s9 + $0x20] sm:$0xff] %v609_v57 }
 0x25e   : > { %626 = vst [vmem:[%s1259_s9 + $0x28] sm:$0xff] %v610_v58 }
 0x262   : > { %v593_v9 = vpop.permute.xlu1 %592 }
 0x263   : > { %v615_v10 = vmul.f32 %v593_v9, %v1085_v2  ;;  %v616_v18 = vmul.f32 %v593_v9, %v1089_v4 }
 0x265   : > { %631 = vst [vmem:[%s1259_s9 + $0x50] sm:$0xff] %v615_v10 }
 0x266   : > { %632 = vst [vmem:[%s1259_s9 + $0x58] sm:$0xff] %v616_v18 }
 0x26a   : > { %v603_v13 = vpop.permute.xlu1 %602 }
 0x26b   : > { %v619_v14 = vmul.f32 %v603_v13, %v1081_v0  ;;  %v620_v19 = vmul.f32 %v603_v13, %v1083_v1 }
 0x26d   : > { %635 = vst [vmem:[%s1259_s9 + $0x70] sm:$0xff] %v619_v14 }
 0x26e   : > { %636 = vst [vmem:[%s1259_s9 + $0x78] sm:$0xff] %v620_v19 }
 0x26f   : > { %908 = shalt.err (!%p905_p4)
}
 0x270   : > { %s953_s12 = smov 256   ;;  %s954_s28 = smov 16  }
 0x271   : > { %764 = dma.vmem_to_hbm [thread:$0]  (%p1035_p11), %s651_s23, 2048, %s653_s25, %s638_s22, %s953_s12, %s953_s12, %s954_s28  }
 0x272 PF: > { %s667_s9 = sand.u32 1, %s935_s18   ;;  %p1338_p7 = scmp.ge.s32.totalorder %s947_s21, 2 }
 0x273   : > { %s668_s14 = scalar_lea.sflag [#allocation4], %s667_s9 }
 0x274   : > { %p771_p5 = pnand %p1338_p7, %p1039_p12 }
 0x276   : > { %p772_p8 = pneg %p771_p5 }
 0x278   : > { %930 = dma.done.wait (%p772_p8), %s668_s14, 2048  }
 0x279   : > { %932 = vsyncadd (%p772_p8), %s668_s14, 4294965248  ;;  %p18_p10 = scmp.ge.s32.totalorder %s1010_s24, 4   ;;  %s1339_s18 = smov %s939_s19 }
 0x27a   : > { %s1340_s19 = smov %s943_s20  ;;  %s1341_s20 = smov %s1022_s27 }
 0x27b   : > { %s1342_s21 = smov %s1010_s24  ;;  %20 = sbr.rel (!%p18_p10) target bundleno = 5 (0x5), region = 85 }
 0x280   :  { %674 = vsyncpa [#allocation3], 1 }
 0x281   :  { %676 = vsyncpa [#allocation3 + $0x1], 1 }
 0x282   :  { %677 = vsyncpa [#allocation4], 1 }
 0x283   :  { %679 = vsyncpa [#allocation4 + $0x1], 1 }

</bundles_post_ra>
